<compile_context>
chip_gen: v6e
topology: v6e:2x2x1
jax: 0.10.0
libtpu: 0.0.40
codegen_flags: <defaults>
</compile_context>

<pallas_src>
import functools

import jax
import jax.numpy as jnp
from jax.experimental import pallas as pl
from jax.experimental.pallas import tpu as pltpu


# ---------------------------------------------------------------------------
# Kernels
# ---------------------------------------------------------------------------
def _pe_add_kernel(x_ref, pe_ref, o_ref):
    # x_ref: (1, TR, L), pe_ref: (TR, L)
    o_ref[...] = (x_ref[...] + pe_ref[...][None, :, :]).astype(o_ref.dtype)


def _pe_add_dropout_kernel(x_ref, pe_ref, bits_ref, o_ref, *, p: float):
    # x_ref: (1, TR, L), pe_ref: (TR, L), bits_ref: (1, TR, L) uint32
    y = x_ref[...] + pe_ref[...][None, :, :]
    thresh = jnp.uint32(min(int(p * 4294967296.0), 4294967295))
    keep = bits_ref[...] >= thresh            # P(keep) = 1 - p (to within 2^-32)
    scale = jnp.asarray(1.0 / (1.0 - p), dtype=y.dtype)
    o_ref[...] = jnp.where(keep, y * scale, jnp.zeros_like(y)).astype(o_ref.dtype)


# ---------------------------------------------------------------------------
# Buffer construction (matches the PyTorch __init__)
# ---------------------------------------------------------------------------
def make_positional_encoding(max_len: int, d_model: int, dtype=jnp.float32):
    position = jnp.arange(max_len, dtype=jnp.float32)[:, None]                  # (max_len, 1)
    div_term = jnp.exp(
        jnp.arange(0, d_model, 2, dtype=jnp.float32) * (-jnp.log(10000.0) / d_model)
    )                                                                            # (d_model/2,)
    pe = jnp.zeros((max_len, d_model), dtype=jnp.float32)
    pe = pe.at[:, 0::2].set(jnp.sin(position * div_term))
    pe = pe.at[:, 1::2].set(jnp.cos(position * div_term))
    return pe.astype(dtype)


# ---------------------------------------------------------------------------
# Tiling helper: largest row tile (multiple of 8, dividing R) with block <= target
# ---------------------------------------------------------------------------
def _choose_row_tile(R: int, L: int, itemsize: int, target_bytes: int = 1 << 20) -> int:
    if R % 8 != 0:
        return R                                   # full extent (valid: equals array dim)
    max_rows = max(8, target_bytes // (L * itemsize))
    tr = min(R, (max_rows // 8) * 8)
    while R % tr != 0:                             # terminates: 8 always divides R here
        tr -= 8
    return tr


# ---------------------------------------------------------------------------
# Forward pass
# ---------------------------------------------------------------------------
def positional_encoding_forward(x, pe, *, p: float = 0.1, training: bool = False, rng=None):
    """x: [B, S, D]; pe: [max_len, D]. Returns dropout(x + pe[:S]) as [B, S, D]."""
    B, S, D = x.shape
    N = S * D

    # Lane-dense view: prefer last dim = 128 so stores are unmasked full-lane writes.
    if N % 128 == 0:
        L, R = 128, N // 128
    else:
        L, R = D, S

    x3 = x.reshape(B, R, L)
    pe3 = pe[:S, :].astype(x.dtype).reshape(R, L)   # elementwise op -> any row-major view ok

    itemsize = jnp.dtype(x.dtype).itemsize
    TR = _choose_row_tile(R, L, itemsize)
    grid = (R // TR, B)                              # row-tile outer, batch inner (pe stays resident)

    x_spec = pl.BlockSpec((1, TR, L), lambda r, b: (b, r, 0))
    pe_spec = pl.BlockSpec((TR, L), lambda r, b: (r, 0))
    o_spec = pl.BlockSpec((1, TR, L), lambda r, b: (b, r, 0))

    use_dropout = training and p > 0.0
    if use_dropout and p >= 1.0:                     # nn.Dropout(p=1) zeroes everything
        return jnp.zeros_like(x)

    if use_dropout:
        if rng is None:
            rng = jax.random.PRNGKey(0)
        # Random bits generated host-side (backend-agnostic), consumed in-kernel.
        bits = jax.random.bits(rng, (B, R, L), dtype=jnp.uint32)
        kernel = functools.partial(_pe_add_dropout_kernel, p=float(p))
        in_specs = [x_spec, pe_spec, pl.BlockSpec((1, TR, L), lambda r, b: (b, r, 0))]
        args = (x3, pe3, bits)
    else:
        kernel = _pe_add_kernel
        in_specs = [x_spec, pe_spec]
        args = (x3, pe3)

    out = pl.pallas_call(
        kernel,
        out_shape=jax.ShapeDtypeStruct((B, R, L), x.dtype),
        grid=grid,
        in_specs=in_specs,
        out_specs=o_spec,
        compiler_params=pltpu.CompilerParams(
            dimension_semantics=("parallel", "parallel"),
        ),
    )(*args)
    return out.reshape(B, S, D)


# ---------------------------------------------------------------------------
# Demo / self-test
# ---------------------------------------------------------------------------
if __name__ == "__main__":
    B, S, D = 2, 8, 32
    MAX_LEN = 64
    P_DROPOUT = 0.1

    key = jax.random.PRNGKey(0)
    kx, kd = jax.random.split(key)
    x = jax.random.normal(kx, (B, S, D), dtype=jnp.float32)
    pe = make_positional_encoding(MAX_LEN, D)

    # Eval mode (dropout is identity) -- exact match against the pure-JAX reference.
    out_eval = jax.block_until_ready(
        positional_encoding_forward(x, pe, p=P_DROPOUT, training=False)
    )
    ref = x + pe[None, :S, :]
    assert out_eval.shape == (B, S, D)
    assert jnp.allclose(out_eval, ref, atol=1e-6), "eval-mode mismatch vs reference"

    # Training mode: every surviving element equals ref/(1-p); dropped elements are 0.
    out_train = jax.block_until_ready(
        positional_encoding_forward(x, pe, p=P_DROPOUT, training=True, rng=kd)
    )
    assert out_train.shape == (B, S, D)
    kept = out_train != 0
    assert jnp.allclose(
        jnp.where(kept, out_train, 0.0),
        jnp.where(kept, ref / (1.0 - P_DROPOUT), 0.0),
        atol=1e-5,
    ), "training-mode kept values do not match scaled reference"

    print("KERNEL_OK")
</pallas_src>

<mosaic_0001>
module attributes {stable_mosaic.version = 11 : i64} {
  func.func @_pe_add_kernel(%arg0: i32, %arg1: i32, %arg2: memref<1x2x128xf32, #tpu.memory_space<vmem>>, %arg3: memref<2x128xf32, #tpu.memory_space<vmem>>, %arg4: memref<1x2x128xf32, #tpu.memory_space<vmem>>) attributes {dimension_semantics = [#tpu.dimension_semantics<parallel>, #tpu.dimension_semantics<parallel>], iteration_bounds = array<i64: 1, 2>, scalar_prefetch = 0 : i64, scratch_operands = 0 : i64, tpu.core_type = #tpu.core_type<tc>, window_params = [{transform_indices = @transform_0, window_bounds = array<i64: 1, 2, 128>}, {transform_indices = @transform_1, window_bounds = array<i64: 2, 128>}, {transform_indices = @transform_2, window_bounds = array<i64: 1, 2, 128>}]} {
    %c0 = arith.constant 0 : index
    %c0_0 = arith.constant 0 : index
    %c0_1 = arith.constant 0 : index
    %0 = vector.load %arg2[%c0, %c0_0, %c0_1] : memref<1x2x128xf32, #tpu.memory_space<vmem>>, vector<1x2x128xf32>
    %c0_2 = arith.constant 0 : index
    %c0_3 = arith.constant 0 : index
    %1 = vector.load %arg3[%c0_2, %c0_3] : memref<2x128xf32, #tpu.memory_space<vmem>>, vector<2x128xf32>
    %2 = vector.shape_cast %1 : vector<2x128xf32> to vector<1x2x128xf32>
    %3 = arith.addf %0, %2 : vector<1x2x128xf32>
    %c0_4 = arith.constant 0 : index
    %c0_5 = arith.constant 0 : index
    %c0_6 = arith.constant 0 : index
    %4 = vector.load %arg4[%c0_4, %c0_5, %c0_6] : memref<1x2x128xf32, #tpu.memory_space<vmem>>, vector<1x2x128xf32>
    tpu.vector_store %arg4[%c0_4, %c0_5, %c0_6], %3 {strides = array<i32>} : memref<1x2x128xf32, #tpu.memory_space<vmem>>, vector<1x2x128xf32>,
    return
  }
  func.func @transform_0(%arg0: i32, %arg1: i32) -> (i32, i32, i32) {
    %c0_i32 = arith.constant 0 : i32
    %c0_i32_0 = arith.constant 0 : i32
    return %arg1, %arg0, %c0_i32 : i32, i32, i32
  }
  func.func @transform_1(%arg0: i32, %arg1: i32) -> (i32, i32) {
    %c0_i32 = arith.constant 0 : i32
    %c0_i32_0 = arith.constant 0 : i32
    return %arg0, %c0_i32 : i32, i32
  }
  func.func @transform_2(%arg0: i32, %arg1: i32) -> (i32, i32, i32) {
    %c0_i32 = arith.constant 0 : i32
    %c0_i32_0 = arith.constant 0 : i32
    return %arg1, %arg0, %c0_i32 : i32, i32, i32
  }
}

</mosaic_0001>

<bundles_post_ra>
// kernel: tpu_custom_call.1
= control target key start
LH: loop header
LB: loop body
LE: loop exit
PB: predicated region body
PF: predicated region fallthrough
CT: control target
= control target key end

     0   :  { %7 = vsyncpa [#allocation3], 0  ;;  %s714_s0 = inlined_call_operand.hbm [shape: f32[2,2,128], index: 0, kind: input, shape index: {}]   ;;  %s715_s1 = inlined_call_operand.hbm [shape: f32[2,128], index: 1, kind: input, shape index: {}]   ;;  %s716_s2 = inlined_call_operand.hbm [shape: f32[2,2,128], index: 2, kind: output, shape index: {}]  }
   0x1   :  { %9 = vsyncpa [#allocation3 + $0x1], 0 }
   0x2   :  { %10 = vsyncpa [#allocation6], 0 }
   0x3   :  { %11 = vsyncpa [#allocation4], 0 }
   0x4   :  { %13 = vsyncpa [#allocation4 + $0x1], 0  ;;  %s553_s9 = smov 0   ;;  %s555_s10 = smov 0  }
   0x5   :  { %s557_s11 = smov 0   ;;  %s559_s12 = smov 0  }
   0x6   :  { %s561_s13 = smov 0   ;;  %s563_s14 = smov 0  }
   0x7 LB: > { %s307_s15 = sadd.s32 4294967295, %s533_s14   ;;  %s308_s16 = sadd.s32 4294967294, %s533_s14   ;;  %s533_s14 = sphi %s563_s14, %s19_s14   ;;  %s529_s13 = sphi %s561_s13, %s733_s13   ;;  %s525_s12 = sphi %s559_s12, %s732_s12   ;;  %s521_s11 = sphi %s557_s11, %s731_s11   ;;  %s517_s10 = sphi %s555_s10, %s730_s10   ;;  %s513_s9 = sphi %s553_s9, %s729_s9  }
   0x8   : > { %p53_p0 = scmp.ne.s32.totalorder %s517_s10, %s513_s9  ;;  %p587_p1 = scmp.eq.s32.totalorder %s307_s15, 0 }
   0x9   : > { %p591_p2 = scmp.eq.s32.totalorder %s307_s15, 1  ;;  %p111_p3 = scmp.eq.s32.totalorder %s308_s16, 1 }
   0xa   : > { %p597_p4 = por %p587_p1, %p53_p0  ;;  %p309_p5 = scmp.ge.s32.totalorder %s533_s14, 1 }
   0xb   : > { %p602_p6 = por %p111_p3, %p53_p0  ;;  %p118_p7 = scmp.lt.s32.totalorder %s533_s14, 3 }
   0xc   : > { %s720_s19 = scalar_select %p597_p4, 1, 0 }
   0xd   : > { %s721_s20 = scalar_select %p602_p6, 1, 0 }
   0xe   : > { %p607_p8 = pnand %p309_p5, %p118_p7  ;;  %s535_s22 = smov [#allocation5]  }
   0xf   : > { %s133_s23 = sshll.u32 %s535_s22, 4  ;;  %s28_s25 = sadd.s32 1, %s529_s13  ;;  %s134_s23 = int_to_ptr.vmem [resolvable:$true] %s133_s23 }
  0x10   : > { %p330_p10 = pneg %p607_p8  ;;  %s40_s26 = sadd.s32 1, %s521_s11 }
  0x11   : > { %p29_p12 = scmp.ge.s32.totalorder %s28_s25, 2  ;;  %s406_s27 = scalar_lea.vmem %s134_s23, 32 }
  0x12   : > { %p616_p11 = pnand %p330_p10, %p587_p1  ;;  %p407_p0 = scmp.ne.s32.totalorder %s134_s23, %s406_s27 }
  0x13   : > { %p414_p7 = scmp.lt.s32.totalorder %s134_s23, %s134_s23  ;;  %p415_p6 = scmp.lt.s32.totalorder %s406_s27, %s406_s27 }
  0x14   : > { %p397_p13 = pneg %p616_p11 }
  0x15   : > { %p416_p9 = por %p415_p6, %p414_p7 }
  0x16   : > { %p409_p3 = pnand %p407_p0, %p397_p13 }
  0x18   : > { %p410_p5 = pneg %p409_p3 }
  0x1a   : > { %p417_p4 = pnand %p416_p9, %p410_p5 }
  0x1c   : > { %420 = shalt.err (!%p417_p4)
}
  0x1d   : > { %333 = dma.hbm_to_vmem [thread:$0]  (!%p616_p11), %s715_s1, 32, %s134_s23, [#allocation6]  }
  0x1e   : > { %s735_s25 = smov (%p29_p12, %s28_s25), 0  ;;  %p47_p6 = scmp.ne.s32.totalorder %s521_s11, %s517_s10 }
  0x1f   : > { %p48_p4 = scmp.eq.s32.totalorder %s533_s14, 0  ;;  %s35_s30 = ssub.s32 %s529_s13, %s735_s25 }
  0x20   : > { %p343_p9 = scmp.lt.s32.totalorder %s533_s14, 2  ;;  %p38_p10 = scmp.eq.s32.totalorder %s35_s30, 0 }
  0x21   : > { %p49_p13 = por %p48_p4, %p47_p6  ;;  %p639_p0 = por %p591_p2, %p47_p6 }
  0x22   : > { %s144_s4 = sand.u32 1, %s521_s11   ;;  %s313_s7 = sshll.u32 %s529_s13, 5 }
  0x23   : > { %s645_s5 = scalar_select %p38_p10, %s521_s11, %s40_s26  }
  0x24   : > { %s312_s6 = sshll.u32 %s144_s4, 1  ;;  %s154_s16 = scalar_lea.hbm %s714_s0, %s313_s7 }
  0x25   : > { %s148_s22 = scalar_lea.vmem [#allocation2], %s312_s6  ;;  %p651_p11 = pnand %p343_p9, %p49_p13 }
  0x26   : > { %s156_s23 = sshll.u32 %s148_s22, 4  ;;  %s145_s18 = scalar_lea.sflag [#allocation3], %s144_s4  ;;  %s157_s23 = int_to_ptr.vmem [resolvable:$true] %s156_s23 }
  0x27   : > { %p423_p2 = pneg %p651_p11  ;;  %s434_s27 = scalar_lea.vmem %s157_s23, 32 }
  0x28   : > { %p435_p12 = scmp.ne.s32.totalorder %s157_s23, %s434_s27  ;;  %s536_s26 = smov [#allocation2]  }
  0x29   : > { %s439_s28 = sshll.u32 %s536_s26, 4  ;;  %s440_s28 = int_to_ptr.vmem [resolvable:$false] %s439_s28 }
  0x2a   : > { %p437_p3 = pnand %p435_p12, %p423_p2  ;;  %s441_s29 = scalar_lea.vmem %s440_s28, 64 }
  0x2b   : > { %p442_p7 = scmp.lt.s32.totalorder %s157_s23, %s440_s28  ;;  %p443_p6 = scmp.lt.s32.totalorder %s441_s29, %s434_s27 }
  0x2c   : > { %p438_p5 = pneg %p437_p3 }
  0x2d   : > { %p444_p4 = por %p443_p6, %p442_p7 }
  0x2f   : > { %p445_p10 = pnand %p444_p4, %p438_p5 }
  0x31   : > { %448 = shalt.err (!%p445_p10)
}
  0x32   : > { %337 = dma.hbm_to_vmem [thread:$0]  (!%p651_p11), %s154_s16, 32, %s157_s23, %s145_s18  }
  0x33   : > { %165 = sbr.rel (%p607_p8) target bundleno = 83 (0x53), region = 28  ;;  %s662_s30 = sand.u32 (!%p607_p8), 1, %s517_s10  }
  0x34   : > { %s315_s4 = sshll.u32 (!%p607_p8), %s662_s30, 1  ;;  %s168_s6 = scalar_lea.sflag (!%p607_p8), [#allocation3], %s662_s30 }
  0x35   : > { %s171_s7 = scalar_lea.vmem (!%p607_p8), [#allocation2], %s315_s4  ;;  %p726_p9 = scmp.ne.s32.totalorder (!%p607_p8), %s720_s19, 0 }
  0x38   : > { %500 = dma.done.wait (%p726_p9), %s168_s6, 32  }
  0x39   : > { %502 = vsyncadd (%p726_p9), %s168_s6, 4294967264 }
  0x3a   : > { %504 = dma.done.wait (%p587_p1), [#allocation6], 32  }
  0x3b   : > { %506 = vsyncadd (%p587_p1), [#allocation6], 4294967264  ;;  %s195_s21 = scalar_lea.vmem [#allocation7], %s315_s4  ;;  %s319_s15 = sshll.u32 %s525_s12, 5  ;;  %v196_v0 = vld [vmem:[%s171_s7] sm:$0x3] }
  0x3c   : > { %s215_s8 = sshll.u32 %s195_s21, 4  ;;  %v197_v1 = vld [vmem:[#allocation5] sm:$0x3]  ;;  %s213_s19 = scalar_lea.hbm %s716_s2, %s319_s15  ;;  %s216_s8 = int_to_ptr.vmem [resolvable:$true] %s215_s8 }
  0x3d   : > { %v198_v2 = vadd.f32 %v197_v1, %v196_v0  ;;  %s201_s23 = scalar_lea.sflag [#allocation4], %s662_s30  ;;  %s449_s24 = scalar_lea.vmem %s216_s8, 32 }
  0x3e   : > { %p450_p8 = scmp.ne.s32.totalorder %s216_s8, %s449_s24  ;;  %s537_s17 = smov [#allocation7]  }
  0x3f   : > { %199 = vst [vmem:[%s195_s21] sm:$0x3] %v198_v2  ;;  %s453_s18 = sshll.u32 %s537_s17, 4  ;;  %s454_s18 = int_to_ptr.vmem [resolvable:$false] %s453_s18 }
  0x40   : > { %p451_p1 = pnand %p450_p8, %p639_p0  ;;  %s455_s27 = scalar_lea.vmem %s454_s18, 64 }
  0x41   : > { %p456_p11 = scmp.lt.s32.totalorder %s216_s8, %s454_s18  ;;  %p457_p2 = scmp.lt.s32.totalorder %s455_s27, %s449_s24 }
  0x42   : > { %p452_p13 = pneg %p451_p1 }
  0x43   : > { %p458_p12 = por %p457_p2, %p456_p11 }
  0x45   : > { %p459_p3 = pnand %p458_p12, %p452_p13 }
  0x47   : > { %462 = shalt.err (!%p459_p3)
}
  0x48   : > { %s463_s12 = scalar_lea.hbm %s213_s19, 32  ;;  %s467_s29 = scalar_lea.hbm %s716_s2, 64 }
  0x49   : > { %p464_p5 = scmp.ne.s32.totalorder %s213_s19, %s463_s12  ;;  %p468_p4 = scmp.lt.s32.totalorder %s213_s19, %s716_s2 }
  0x4a   : > { %p469_p10 = scmp.lt.s32.totalorder %s467_s29, %s463_s12 }
  0x4b   : > { %p465_p7 = pnand %p464_p5, %p639_p0 }
  0x4c   : > { %p470_p9 = por %p469_p10, %p468_p4 }
  0x4d   : > { %p466_p6 = pneg %p465_p7 }
  0x4f   : > { %p471_p8 = pnand %p470_p9, %p466_p6 }
  0x51   : > { %474 = shalt.err (!%p471_p8)
}
  0x52   : > { %328 = dma.vmem_to_hbm [thread:$0]  (%p639_p0), %s216_s8, 32, %s213_s19, %s201_s23  }
  0x53 PF: > { %s227_s6 = sand.u32 1, %s513_s9   ;;  %p727_p1 = scmp.ne.s32.totalorder %s721_s20, 0 }
  0x54   : > { %p728_p13 = scmp.ge.s32.totalorder %s533_s14, 2  ;;  %s228_s7 = scalar_lea.sflag [#allocation4], %s227_s6 }
  0x56   : > { %p339_p11 = pnand %p728_p13, %p727_p1 }
  0x58   : > { %p340_p2 = pneg %p339_p11 }
  0x5a   : > { %508 = dma.done.wait (%p340_p2), %s228_s7, 32  }
  0x5b   : > { %510 = vsyncadd (%p340_p2), %s228_s7, 4294967264  ;;  %s19_s14 = sadd.s32 1, %s533_s14   ;;  %s729_s9 = smov %s517_s10 }
  0x5c   : > { %p16_p12 = scmp.ge.s32.totalorder %s19_s14, 4   ;;  %s730_s10 = smov %s521_s11 }
  0x5d   : > { %s731_s11 = smov %s645_s5  ;;  %s732_s12 = smov %s529_s13 }
  0x5e   : > { %s733_s13 = smov %s735_s25  ;;  %18 = sbr.rel (!%p16_p12) target bundleno = 7 (0x7), region = 78 }
  0x63   :  { %233 = vsyncpa [#allocation3], 1 }
  0x64   :  { %235 = vsyncpa [#allocation3 + $0x1], 1 }
  0x65   :  { %236 = vsyncpa [#allocation6], 1 }
  0x66   :  { %237 = vsyncpa [#allocation4], 1 }
  0x67   :  { %239 = vsyncpa [#allocation4 + $0x1], 1 }

</bundles_post_ra>
